<compile_context>
chip_gen: v7x
topology: tpu7x:2x2x1
jax: 0.10.0
libtpu: 0.0.40
codegen_flags: <defaults>
</compile_context>

<pallas_src>
import functools

import jax
import jax.numpy as jnp
from jax.experimental import pallas as pl
from jax.experimental.pallas import tpu as pltpu


_DEFAULT_MAX_CLASS_CHUNK = 8192   # multiple of 128; streaming-C chunk cap


def _ce_kernel(logits_ref, labels_ref, out_ref, m_sc, l_sc, t_sc, *,
               n_total, c_total, tile_rows, tile_cols):
    """Online (streaming-C) cross entropy over one (TN, TC) tile.

    grid = (batch tiles [parallel], class chunks [arbitrary, last]).
    Running row-max / rescaled exp-sum / target-logit live in (TN, 1) f32
    VMEM scratch; the (1, 8, 128) per-batch-tile partial sum is written at
    the final class chunk (lane/sublane-dense -> unmasked vst).
    """
    i = pl.program_id(0)
    k = pl.program_id(1)

    @pl.when(k == 0)
    def _():
        m_sc[...] = jnp.full_like(m_sc, -jnp.inf)
        l_sc[...] = jnp.zeros_like(l_sc)
        t_sc[...] = jnp.zeros_like(t_sc)

    logits = logits_ref[...]                       # (TN, TC), input dtype
    labels = labels_ref[...]                       # (TN, 1) int32
    tn, tc = logits.shape

    # Global class ids of this chunk (lane iota; no cross-lane gather).
    # TODO(synk): on v7x/bf16 this iota could be hoisted into a persistent
    # VMEM scratch filled once at (i==0, k==0); kept inline here because the
    # scratch would cost as much VMEM as a full input tile.
    col_ids = jax.lax.broadcasted_iota(jnp.int32, (tn, tc), 1) + k * tile_cols

    # Mask class-padding columns of a ragged last chunk (true select, so
    # NaN/garbage in block padding cannot leak). Statically skipped when C
    # divides the chunk size evenly.
    if c_total % tile_cols != 0:
        neg_inf = jnp.asarray(-jnp.inf, dtype=logits.dtype)
        masked = jnp.where(col_ids < c_total, logits, neg_inf)
    else:
        masked = logits

    # Row max / subtract stay in the input dtype (bf16 VALU on v6e/v7x,
    # no-op for f32); exp and all accumulators are f32.
    chunk_max = jnp.max(masked, axis=-1, keepdims=True)          # (TN, 1)
    chunk_max_f32 = chunk_max.astype(jnp.float32)
    m_old = m_sc[...]
    m_new = jnp.maximum(m_old, chunk_max_f32)

    shifted = (masked - chunk_max).astype(jnp.float32)           # <= 0
    p = jnp.exp(shifted + (chunk_max_f32 - m_new))               # == exp(x - m_new)
    l_sc[...] = (l_sc[...] * jnp.exp(m_old - m_new)
                 + jnp.sum(p, axis=-1, keepdims=True))
    m_sc[...] = m_new

    # Target logit: direct select-reduce (no materialized one-hot, no extra
    # (TN, TC) f32 temporary). The label hits exactly one chunk.
    picked = jnp.where(col_ids == labels, logits, jnp.zeros((), logits.dtype))
    t_sc[...] += jnp.sum(picked, axis=-1, keepdims=True).astype(jnp.float32)

    @pl.when(k == pl.num_programs(1) - 1)
    def _():
        per_row = m_sc[...] + jnp.log(l_sc[...]) - t_sc[...]     # (TN, 1)
        # Mask rows past the true batch size (ragged last batch tile).
        row_ids = jax.lax.broadcasted_iota(jnp.int32, (tn, 1), 0) + i * tile_rows
        per_row = jnp.where(row_ids < n_total, per_row, 0.0)
        tile_sum = jnp.sum(per_row)
        out_ref[...] = jnp.broadcast_to(
            tile_sum.reshape(1, 1, 1), (1, 8, 128)).astype(jnp.float32)


def _vmem_budget():
    """Generation-aware (tile_budget_bytes, vmem_limit_hint_bytes)."""
    try:
        cap = pltpu.get_tpu_info().vmem_capacity_bytes
    except Exception:                    # fallback: assume the smallest (v7x)
        cap = 64 * 1024 * 1024
    if cap >= 96 * 1024 * 1024:          # v5e / v6e: 128 MiB physical VMEM
        return 56 * 1024 * 1024, 100 * 1024 * 1024
    # v7x: 64 MiB physical; leave headroom for Mosaic scratch / semaphores.
    return 26 * 1024 * 1024, 48 * 1024 * 1024


def _choose_tiles(n: int, c: int, in_itemsize: int, max_class_chunk: int):
    """Pick (TN, TC, vmem_limit) so the working set fits the per-gen budget."""
    budget, vmem_limit = _vmem_budget()

    # Class chunk: full C when modest, otherwise stream it in multiple-of-128
    # chunks so TN stays large on every generation.
    tc = c if c <= max_class_chunk else max_class_chunk

    # Working set per batch row: double-buffered input chunk + ~3 f32
    # (TN, TC) temporaries (exp chunk + transient select/cast copies).
    bytes_per_row = tc * (2 * in_itemsize + 3 * 4)
    tn = budget // max(bytes_per_row, 1)
    tn = int(max(8, min(16384, (tn // 8) * 8)))    # multiple of 8 sublanes

    if tn >= n:
        if n >= 32:
            # Guarantee >= 4 batch tiles so BlockSpec double-buffering has
            # something to overlap and both v7x TensorCores get work.
            tn = max(8, ((n // 4) // 8) * 8)
        else:
            tn = n                                  # tiny batch: one full tile
    else:
        num_tiles = -(-n // tn)
        if num_tiles < 4 and n >= 32:
            tn = max(8, min(tn, ((n // 4) // 8) * 8))

    return tn, tc, vmem_limit


def cross_entropy_loss(predicted_feature: jax.Array, binary_label: jax.Array, *,
                       max_class_chunk: int = _DEFAULT_MAX_CLASS_CHUNK) -> jax.Array:
    """Pallas-backed equivalent of torch.nn.CrossEntropyLoss()(logits, labels).

    predicted_feature: (N, C) float logits (float32 or bfloat16).
    binary_label:      (N,)   integer class indices in [0, C).
    Returns a scalar float32 loss (mean over the batch).
    """
    n, c = predicted_feature.shape
    labels_2d = binary_label.reshape(n, 1).astype(jnp.int32)
    in_itemsize = jnp.dtype(predicted_feature.dtype).itemsize

    tn, tc, vmem_cap = _choose_tiles(n, c, in_itemsize, max_class_chunk)
    num_n = -(-n // tn)
    num_c = -(-c // tc)

    kernel = functools.partial(_ce_kernel, n_total=n, c_total=c,
                               tile_rows=tn, tile_cols=tc)

    # Scoped-VMEM hint: double-buffered input tiles + f32 temporaries + slack.
    vmem_needed = (2 * (tn * tc * in_itemsize + tn * 128 * 4)
                   + 3 * tn * tc * 4 + (2 << 20))
    vmem_limit = int(min(max(vmem_needed, 16 * 1024 * 1024), vmem_cap))

    cost = pl.CostEstimate(
        flops=5 * n * c,
        transcendentals=n * c,
        bytes_accessed=n * c * in_itemsize + n * 4 + num_n * 8 * 128 * 4,
    )

    partials = pl.pallas_call(
        kernel,
        out_shape=jax.ShapeDtypeStruct((num_n, 8, 128), jnp.float32),
        grid=(num_n, num_c),
        in_specs=[
            pl.BlockSpec((tn, tc), lambda i, k: (i, k)),   # logits tile
            pl.BlockSpec((tn, 1), lambda i, k: (i, 0)),    # labels tile
        ],
        out_specs=pl.BlockSpec((1, 8, 128), lambda i, k: (i, 0, 0)),
        scratch_shapes=[pltpu.VMEM((tn, 1), jnp.float32),  # running max
                        pltpu.VMEM((tn, 1), jnp.float32),  # running exp-sum
                        pltpu.VMEM((tn, 1), jnp.float32)], # target logit
        compiler_params=pltpu.CompilerParams(
            dimension_semantics=("parallel", "arbitrary"),
            vmem_limit_bytes=vmem_limit,
        ),
        cost_estimate=cost,
    )(predicted_feature, labels_2d)

    # Each batch tile broadcast its partial sum across its (8,128) slab.
    per_tile = partials[:, 0, 0]                    # (num_n,)
    return jnp.sum(per_tile) * (1.0 / n)            # divide by total N


if __name__ == "__main__":
    key = jax.random.PRNGKey(0)
    k_logits, k_labels, k_logits2, k_labels2 = jax.random.split(key, 4)

    # Small deterministic example matching the module: (N, C) logits + labels.
    N, C = 8, 32
    predicted_feature = jax.random.normal(k_logits, (N, C), dtype=jnp.float32)
    binary_label = jax.random.randint(k_labels, (N,), 0, C, dtype=jnp.int32)

    loss = jax.block_until_ready(cross_entropy_loss(predicted_feature, binary_label))

    # Pure-JAX reference (same math as torch.nn.CrossEntropyLoss, mean reduction).
    log_probs = jax.nn.log_softmax(predicted_feature, axis=-1)
    ref = -jnp.mean(log_probs[jnp.arange(N), binary_label])
    assert jnp.allclose(loss, ref, atol=1e-5, rtol=1e-5), (loss, ref)

    # bfloat16 logits path (bf16 max/subtract inside the kernel, f32 exp/accum;
    # tolerance reflects the intentionally-bf16 subtract).
    pf_bf16 = predicted_feature.astype(jnp.bfloat16)
    loss_bf16 = jax.block_until_ready(cross_entropy_loss(pf_bf16, binary_label))
    log_probs_bf16 = jax.nn.log_softmax(pf_bf16.astype(jnp.float32), axis=-1)
    ref_bf16 = -jnp.mean(log_probs_bf16[jnp.arange(N), binary_label])
    assert jnp.allclose(loss_bf16, ref_bf16, atol=1e-2, rtol=1e-2), (loss_bf16, ref_bf16)

    # Exercise the streaming-C / multi-batch-tile / ragged-row / ragged-column
    # paths at small scale by lowering the class-chunk cap.
    N2, C2 = 42, 160
    pf2 = jax.random.normal(k_logits2, (N2, C2), dtype=jnp.float32)
    lb2 = jax.random.randint(k_labels2, (N2,), 0, C2, dtype=jnp.int32)
    loss2 = jax.block_until_ready(cross_entropy_loss(pf2, lb2, max_class_chunk=128))
    ref2 = -jnp.mean(jax.nn.log_softmax(pf2, axis=-1)[jnp.arange(N2), lb2])
    assert jnp.allclose(loss2, ref2, atol=1e-5, rtol=1e-5), (loss2, ref2)

    print("KERNEL_OK")
</pallas_src>

<mosaic_0001>
module attributes {stable_mosaic.version = 11 : i64} {
  func.func @_ce_kernel(%arg0: i32, %arg1: i32, %arg2: memref<8x32xf32, #tpu.memory_space<vmem>>, %arg3: memref<8x1xi32, #tpu.memory_space<vmem>>, %arg4: memref<1x8x128xf32, #tpu.memory_space<vmem>>, %arg5: memref<8x1xf32, #tpu.memory_space<vmem>>, %arg6: memref<8x1xf32, #tpu.memory_space<vmem>>, %arg7: memref<8x1xf32, #tpu.memory_space<vmem>>) attributes {dimension_semantics = [#tpu.dimension_semantics<parallel>, #tpu.dimension_semantics<arbitrary>], iteration_bounds = array<i64: 1, 1>, scalar_prefetch = 0 : i64, scratch_operands = 3 : i64, tpu.core_type = #tpu.core_type<tc>, window_params = [{transform_indices = @transform_0, window_bounds = array<i64: 8, 32>}, {transform_indices = @transform_1, window_bounds = array<i64: 8, 1>}, {transform_indices = @transform_2, window_bounds = array<i64: 1, 8, 128>}]} {
    %c0_i32 = arith.constant 0 : i32
    %0 = arith.cmpi eq, %arg1, %c0_i32 : i32
    %1 = arith.extui %0 : i1 to i32
    %c0_i32_0 = arith.constant 0 : i32
    %2 = arith.cmpi ne, %1, %c0_i32_0 : i32
    scf.if %2 {
      %cst_21 = arith.constant 0xFF800000 : f32
      %40 = vector.broadcast %cst_21 : f32 to vector<8x1xf32>
      %c0_22 = arith.constant 0 : index
      %c0_23 = arith.constant 0 : index
      %41 = vector.load %arg5[%c0_22, %c0_23] : memref<8x1xf32, #tpu.memory_space<vmem>>, vector<8x1xf32>
      tpu.vector_store %arg5[%c0_22, %c0_23], %40 {strides = array<i32>} : memref<8x1xf32, #tpu.memory_space<vmem>>, vector<8x1xf32>,
      %cst_24 = arith.constant 0.000000e+00 : f32
      %42 = vector.broadcast %cst_24 : f32 to vector<8x1xf32>
      %c0_25 = arith.constant 0 : index
      %c0_26 = arith.constant 0 : index
      %43 = vector.load %arg6[%c0_25, %c0_26] : memref<8x1xf32, #tpu.memory_space<vmem>>, vector<8x1xf32>
      tpu.vector_store %arg6[%c0_25, %c0_26], %42 {strides = array<i32>} : memref<8x1xf32, #tpu.memory_space<vmem>>, vector<8x1xf32>,
      %cst_27 = arith.constant 0.000000e+00 : f32
      %44 = vector.broadcast %cst_27 : f32 to vector<8x1xf32>
      %c0_28 = arith.constant 0 : index
      %c0_29 = arith.constant 0 : index
      %45 = vector.load %arg7[%c0_28, %c0_29] : memref<8x1xf32, #tpu.memory_space<vmem>>, vector<8x1xf32>
      tpu.vector_store %arg7[%c0_28, %c0_29], %44 {strides = array<i32>} : memref<8x1xf32, #tpu.memory_space<vmem>>, vector<8x1xf32>,
    } else {
    }
    %c0 = arith.constant 0 : index
    %c0_1 = arith.constant 0 : index
    %3 = vector.load %arg2[%c0, %c0_1] : memref<8x32xf32, #tpu.memory_space<vmem>>, vector<8x32xf32>
    %c0_2 = arith.constant 0 : index
    %c0_3 = arith.constant 0 : index
    %4 = vector.load %arg3[%c0_2, %c0_3] : memref<8x1xi32, #tpu.memory_space<vmem>>, vector<8x1xi32>
    %5 = tpu.iota {dimensions = array<i32: 1>} : vector<8x32xi32>
    %c32_i32 = arith.constant 32 : i32
    %6 = arith.muli %arg1, %c32_i32 : i32
    %7 = vector.broadcast %6 : i32 to vector<8x32xi32>
    %8 = arith.addi %5, %7 : vector<8x32xi32>
    %cst = arith.constant dense<0xFF800000> : vector<8xf32>
    %9 = vector.multi_reduction <maximumf>, %3, %cst [1] : vector<8x32xf32> to vector<8xf32>
    %10 = vector.shape_cast %9 : vector<8xf32> to vector<8x1xf32>
    %c0_4 = arith.constant 0 : index
    %c0_5 = arith.constant 0 : index
    %11 = vector.load %arg5[%c0_4, %c0_5] : memref<8x1xf32, #tpu.memory_space<vmem>>, vector<8x1xf32>
    %12 = arith.maximumf %11, %10 : vector<8x1xf32>
    %13 = vector.broadcast %10 : vector<8x1xf32> to vector<8x32xf32>
    %14 = arith.subf %3, %13 : vector<8x32xf32>
    %15 = arith.subf %10, %12 : vector<8x1xf32>
    %16 = vector.broadcast %15 : vector<8x1xf32> to vector<8x32xf32>
    %17 = arith.addf %14, %16 : vector<8x32xf32>
    %18 = math.exp %17 : vector<8x32xf32>
    %c0_6 = arith.constant 0 : index
    %c0_7 = arith.constant 0 : index
    %19 = vector.load %arg6[%c0_6, %c0_7] : memref<8x1xf32, #tpu.memory_space<vmem>>, vector<8x1xf32>
    %20 = arith.subf %11, %12 : vector<8x1xf32>
    %21 = math.exp %20 : vector<8x1xf32>
    %22 = arith.mulf %19, %21 : vector<8x1xf32>
    %cst_8 = arith.constant dense<0.000000e+00> : vector<8xf32>
    %23 = vector.multi_reduction <add>, %18, %cst_8 [1] : vector<8x32xf32> to vector<8xf32>
    %24 = vector.shape_cast %23 : vector<8xf32> to vector<8x1xf32>
    %25 = arith.addf %22, %24 : vector<8x1xf32>
    %c0_9 = arith.constant 0 : index
    %c0_10 = arith.constant 0 : index
    %26 = vector.load %arg6[%c0_9, %c0_10] : memref<8x1xf32, #tpu.memory_space<vmem>>, vector<8x1xf32>
    tpu.vector_store %arg6[%c0_9, %c0_10], %25 {strides = array<i32>} : memref<8x1xf32, #tpu.memory_space<vmem>>, vector<8x1xf32>,
    %c0_11 = arith.constant 0 : index
    %c0_12 = arith.constant 0 : index
    %27 = vector.load %arg5[%c0_11, %c0_12] : memref<8x1xf32, #tpu.memory_space<vmem>>, vector<8x1xf32>
    tpu.vector_store %arg5[%c0_11, %c0_12], %12 {strides = array<i32>} : memref<8x1xf32, #tpu.memory_space<vmem>>, vector<8x1xf32>,
    %28 = vector.broadcast %4 : vector<8x1xi32> to vector<8x32xi32>
    %29 = arith.cmpi eq, %8, %28 : vector<8x32xi32>
    %cst_13 = arith.constant 0.000000e+00 : f32
    %30 = vector.broadcast %cst_13 : f32 to vector<8x32xf32>
    %31 = arith.select %29, %3, %30 : vector<8x32xi1>, vector<8x32xf32>
    %c0_14 = arith.constant 0 : index
    %c0_15 = arith.constant 0 : index
    %32 = vector.load %arg7[%c0_14, %c0_15] : memref<8x1xf32, #tpu.memory_space<vmem>>, vector<8x1xf32>
    %cst_16 = arith.constant dense<0.000000e+00> : vector<8xf32>
    %33 = vector.multi_reduction <add>, %31, %cst_16 [1] : vector<8x32xf32> to vector<8xf32>
    %34 = vector.shape_cast %33 : vector<8xf32> to vector<8x1xf32>
    %35 = arith.addf %32, %34 : vector<8x1xf32>
    %c0_17 = arith.constant 0 : index
    %c0_18 = arith.constant 0 : index
    %36 = vector.load %arg7[%c0_17, %c0_18] : memref<8x1xf32, #tpu.memory_space<vmem>>, vector<8x1xf32>
    tpu.vector_store %arg7[%c0_17, %c0_18], %35 {strides = array<i32>} : memref<8x1xf32, #tpu.memory_space<vmem>>, vector<8x1xf32>,
    %c0_i32_19 = arith.constant 0 : i32
    %37 = arith.cmpi eq, %arg1, %c0_i32_19 : i32
    %38 = arith.extui %37 : i1 to i32
    %c0_i32_20 = arith.constant 0 : i32
    %39 = arith.cmpi ne, %38, %c0_i32_20 : i32
    scf.if %39 {
      %c0_21 = arith.constant 0 : index
      %c0_22 = arith.constant 0 : index
      %40 = vector.load %arg5[%c0_21, %c0_22] : memref<8x1xf32, #tpu.memory_space<vmem>>, vector<8x1xf32>
      %c0_23 = arith.constant 0 : index
      %c0_24 = arith.constant 0 : index
      %41 = vector.load %arg6[%c0_23, %c0_24] : memref<8x1xf32, #tpu.memory_space<vmem>>, vector<8x1xf32>
      %42 = math.log %41 : vector<8x1xf32>
      %43 = arith.addf %40, %42 : vector<8x1xf32>
      %c0_25 = arith.constant 0 : index
      %c0_26 = arith.constant 0 : index
      %44 = vector.load %arg7[%c0_25, %c0_26] : memref<8x1xf32, #tpu.memory_space<vmem>>, vector<8x1xf32>
      %45 = arith.subf %43, %44 : vector<8x1xf32>
      %46 = tpu.iota {dimensions = array<i32: 0>} : vector<8x1xi32>
      %c8_i32 = arith.constant 8 : i32
      %47 = arith.muli %arg0, %c8_i32 : i32
      %48 = vector.broadcast %47 : i32 to vector<8x1xi32>
      %49 = arith.addi %46, %48 : vector<8x1xi32>
      %c8_i32_27 = arith.constant 8 : i32
      %50 = vector.broadcast %c8_i32_27 : i32 to vector<8x1xi32>
      %51 = arith.cmpi slt, %49, %50 : vector<8x1xi32>
      %cst_28 = arith.constant 0.000000e+00 : f32
      %52 = vector.broadcast %cst_28 : f32 to vector<8x1xf32>
      %53 = arith.select %51, %45, %52 : vector<8x1xi1>, vector<8x1xf32>
      %54 = vector.shape_cast %53 : vector<8x1xf32> to vector<1x8x1xf32>
      %cst_29 = arith.constant dense<0.000000e+00> : vector<1xf32>
      %55 = vector.multi_reduction <add>, %54, %cst_29 [1, 2] : vector<1x8x1xf32> to vector<1xf32>
      %56 = vector.shape_cast %55 : vector<1xf32> to vector<1x1x1xf32>
      %57 = vector.extract %56[0, 0, 0] : f32 from vector<1x1x1xf32>
      %58 = vector.broadcast %57 : f32 to vector<1x1x1xf32>
      %59 = vector.shape_cast %58 : vector<1x1x1xf32> to vector<1x1x1xf32>
      %60 = vector.broadcast %59 : vector<1x1x1xf32> to vector<1x8x128xf32>
      %c0_30 = arith.constant 0 : index
      %c0_31 = arith.constant 0 : index
      %c0_32 = arith.constant 0 : index
      %61 = vector.load %arg4[%c0_30, %c0_31, %c0_32] : memref<1x8x128xf32, #tpu.memory_space<vmem>>, vector<1x8x128xf32>
      tpu.vector_store %arg4[%c0_30, %c0_31, %c0_32], %60 {strides = array<i32>} : memref<1x8x128xf32, #tpu.memory_space<vmem>>, vector<1x8x128xf32>,
    } else {
    }
    return
  }
  func.func @transform_0(%arg0: i32, %arg1: i32) -> (i32, i32) {
    %c0_i32 = arith.constant 0 : i32
    return %arg0, %arg1 : i32, i32
  }
  func.func @transform_1(%arg0: i32, %arg1: i32) -> (i32, i32) {
    %c0_i32 = arith.constant 0 : i32
    %c0_i32_0 = arith.constant 0 : i32
    return %arg0, %c0_i32 : i32, i32
  }
  func.func @transform_2(%arg0: i32, %arg1: i32) -> (i32, i32, i32) {
    %c0_i32 = arith.constant 0 : i32
    %c0_i32_0 = arith.constant 0 : i32
    %c0_i32_1 = arith.constant 0 : i32
    return %arg0, %c0_i32, %c0_i32_0 : i32, i32, i32
  }
}

</mosaic_0001>

<bundles_post_ra>
// kernel: tpu_custom_call.1
= control target key start
LH: loop header
LB: loop body
LE: loop exit
PB: predicated region body
PF: predicated region fallthrough
CT: control target
= control target key end

     0   :  { %vm27_vm0 = vcmask 261120   ;;  %s194_s0 = inlined_call_operand.vmem [shape: f32[8,32], index: 0, kind: input, shape index: {}]   ;;  %s195_s1 = inlined_call_operand.vmem [shape: s32[8,1], index: 1, kind: input, shape index: {}]   ;;  %s196_s2 = inlined_call_operand.hbm [shape: f32[1,8,128], index: 2, kind: output, shape index: {}]  }
   0x1   :  { %v20_v0 = vld [vmem:[%s194_s0] sm:$0xff] }
   0x2   :  { %7 = vsyncpa [#allocation6], 0  ;;  %v28_v1 = vsel %vm27_vm0, %v20_v0, -inf  ;;  %vm16_vm1 = vcmask 7168   ;;  %v147_v2 = vmov -inf   ;;  %v148_v3 = vmov 0  }
   0x3   :  { %29 = vmax.xlane.f32.xlu0 %v28_v1  ;;  %17 = vst.msk [vmem:[#allocation2] sm:$0xff] %vm16_vm1, %v147_v2  ;;  %116 = vset.pattern.permute.xlu1 %v148_v3  ;;  %v21_v4 = vld [vmem:[%s195_s1] sm:$0xff]  ;;  %v149_v5 = vmov 0.0   ;;  %v22_v15 = vlaneseq  ;;  %s150_s0 = smov [#allocation5]  }
   0x4   :  { %115 = vset.pattern.permute.xlu0 %v148_v3  ;;  %56 = vperm.xlu1 %116, %v21_v4   ;;  %18 = vst.msk [vmem:[#allocation3] sm:$0xff] %vm16_vm1, %v149_v5  ;;  %19 = vst.msk [vmem:[#allocation4] sm:$0xff] %vm16_vm1, %v149_v5  ;;  %s101_s1 = sshll.u32 %s150_s0, 4  ;;  %s102_s1 = int_to_ptr.vmem [resolvable:$true] %s101_s1 }
   0x5   :  { %v23_v16 = vand.u32 127, %v22_v15  ;;  %s123_s14 = scalar_lea.vmem %s102_s1, 128  ;;  %p128_p1 = scmp.lt.s32.totalorder %s102_s1, %s102_s1 }
   0x6   :  { %p124_p0 = scmp.ne.s32.totalorder %s102_s1, %s123_s14  ;;  %p129_p2 = scmp.lt.s32.totalorder %s123_s14, %s123_s14 }
   0x8   :  { %p130_p3 = por %p129_p2, %p128_p1 }
   0xa   :  { %v31_v6 = vld [vmem:[#allocation2] sm:$0xff]  ;;  %p131_p4 = pnand %p130_p3, %p124_p0 }
   0xb   :  { %v43_v24 = vld [vmem:[#allocation3] sm:$0xff]  ;;  %v60_v28 = vld [vmem:[#allocation4] sm:$0xff] }
  0x83   :  { %v57_v17 = vpop.permute.xlu1 %56 }
  0x84   :  { %vm58_vm2 = vcmp.eq.s32.totalorder %v23_v16, %v57_v17 }
  0x85   :  { %v59_v19 = vsel %vm58_vm2, %v20_v0, 0.0 }
  0x86   :  { %v61_v21 = vsel %vm27_vm0, %v59_v19, 0.0 }
  0x90   :  { %v30_v7 = vpop.xlane.xlu0 %29 }
  0x91   :  { %v32_v8 = vmax.f32 %v31_v6, %v30_v7  ;;  %v33_v11 = vsub.f32 %v20_v0, %v30_v7 }
  0x93   :  { %v34_v9 = vsub.f32 %v30_v7, %v32_v8  ;;  %v44_v10 = vsub.f32 %v31_v6, %v32_v8  ;;  %54 = vst.msk [vmem:[#allocation2] sm:$0xff] %vm16_vm1, %v32_v8 }
  0x95   :  { %37 = vperm.xlu0 %115, %v34_v9   ;;  %v45_v22 = vmul.f32 1.442695, %v44_v10 }
  0x9a   :  { %v69_v34 = vld [vmem:[#allocation2] sm:$0xff] }
 0x114   :  { %v38_v12 = vpop.permute.xlu0 %37 }
 0x115   :  { %v40_v13 = vadd.f32 %v38_v12, %v33_v11 }
 0x117   :  { %v41_v14 = vmul.f32 1.442695, %v40_v13 }
 0x119   :  { %117 = vpow2.f32 %v41_v14 }
 0x11a   :  { %119 = vpow2.f32 %v45_v22 }
 0x123   :  { %v118_v18 = vpop.eup %117 }
 0x124   :  { %v48_v20 = vsel %vm27_vm0, %v118_v18, 0.0  ;;  %v120_v23 = vpop.eup %119 }
 0x125   :  { %49 = vadd.xlane.f32.xlu1 %v48_v20  ;;  %v47_v25 = vmul.f32 %v120_v23, %v43_v24 }
 0x129   :  { %62 = vadd.xlane.f32.xlu1 %v61_v21 }
 0x1b2   :  { %v50_v26 = vpop.xlane.xlu1 %49 }
 0x1b3   :  { %v51_v27 = vadd.f32 %v50_v26, %v47_v25 }
 0x1b5   :  { %53 = vst.msk [vmem:[#allocation3] sm:$0xff] %vm16_vm1, %v51_v27 }
 0x1b6   :  { %v63_v29 = vpop.xlane.xlu1 %62 }
 0x1b7   :  { %v64_v30 = vadd.f32 %v63_v29, %v60_v28 }
 0x1b9   :  { %65 = vst.msk [vmem:[#allocation4] sm:$0xff] %vm16_vm1, %v64_v30 }
 0x1bc   :  { %v70_v31 = vld [vmem:[#allocation3] sm:$0xff] }
 0x1bd   :  { %121 = vlog2.f32 %v70_v31 }
 0x1c0   :  { %v74_v35 = vld [vmem:[#allocation4] sm:$0xff] }
 0x1c7   :  { %v122_v32 = vpop.eup %121 }
 0x1c8   :  { %v72_v33 = vmul.f32 0.6931472, %v122_v32 }
 0x1ca   :  { %v73_v36 = vadd.f32 %v72_v33, %v69_v34 }
 0x1cc   :  { %v75_v37 = vsub.f32 %v73_v36, %v74_v35 }
 0x1ce   :  { %v83_v38 = vsel %vm16_vm1, %v75_v37, 0.0 }
 0x1cf   :  { %84 = vadd.xlane.f32.xlu1 %v83_v38 }
 0x25c   :  { %v85_v39 = vpop.xlane.xlu1 %84 }
 0x25d   :  { %v86_v40 = vrot.slane %v85_v39, 4 }
 0x25f   :  { %v87_v41 = vadd.f32 %v86_v40, %v85_v39 }
 0x261   :  { %v88_v42 = vrot.slane %v87_v41, 2 }
 0x263   :  { %v89_v43 = vadd.f32 %v88_v42, %v87_v41 }
 0x265   :  { %v90_v44 = vrot.slane %v89_v43, 1 }
 0x267   :  { %v91_v45 = vadd.f32 %v90_v44, %v89_v43 }
 0x269   :  { %109 = vpush %v91_v45 }
 0x29a   :  { %s110_s13 = spop %109 }
 0x29b   :  { %v93_v46 = vstv %s110_s13 }
 0x29c   :  { %94 = vst [vmem:[#allocation5] sm:$0xff] %v93_v46 }
 0x29d   :  { %134 = shalt.err (!%p131_p4)
}
 0x29e   :  { %s135_s17 = scalar_lea.hbm %s196_s2, 128 }
 0x29f   :  { %p136_p5 = scmp.ne.s32.totalorder %s196_s2, %s135_s17  ;;  %p139_p6 = scmp.lt.u32.totalorder %s135_s17, %s196_s2 }
 0x2a1   :  { %p141_p7 = pnand %p139_p6, %p136_p5 }
 0x2a3   :  { %144 = shalt.err (!%p141_p7)
}
 0x2a4   :  { %104 = dma.vmem_to_hbm [thread:$0]  %s102_s1, 128, %s196_s2, [#allocation6]  }
 0x2a5   :  { %145 = dma.done.wait [#allocation6], 128  }
 0x2a6   :  { %146 = vsyncadd [#allocation6], 4294967168 }
 0x2a7   :  { %108 = vsyncpa [#allocation6], 1 }

</bundles_post_ra>
